<compile_context>
chip_gen: v5e
topology: v5e:2x2
jax: 0.10.0
libtpu: 0.0.40
codegen_flags: <defaults>
</compile_context>

<pallas_src>
import jax
import jax.numpy as jnp
from jax.experimental import pallas as pl
from jax.experimental.pallas import tpu as pltpu

LN_EPS = 1e-5  # torch.nn.LayerNorm default


# ---------------------------------------------------------------------------
# Kernels
# ---------------------------------------------------------------------------
def _layernorm_kernel(x_ref, gb_ref, o_ref):
    """Row-wise LayerNorm over the last dim.

    x_ref: (TILE_ROWS, D)   gb_ref: (2, D) [gamma; beta]   o_ref: (TILE_ROWS, D)
    """
    x = x_ref[...].astype(jnp.float32)
    mean = jnp.mean(x, axis=-1, keepdims=True)
    centered = x - mean
    var = jnp.mean(centered * centered, axis=-1, keepdims=True)  # biased, like torch
    inv = jax.lax.rsqrt(var + LN_EPS)
    gamma = gb_ref[0:1, :].astype(jnp.float32)
    beta = gb_ref[1:2, :].astype(jnp.float32)
    o_ref[...] = (centered * inv * gamma + beta).astype(o_ref.dtype)


def _layernorm_residual_kernel(x_ref, gb_ref, r_ref, o_ref):
    """Fused LayerNorm(x) + residual (one extra blocked input, one HBM write)."""
    x = x_ref[...].astype(jnp.float32)
    mean = jnp.mean(x, axis=-1, keepdims=True)
    centered = x - mean
    var = jnp.mean(centered * centered, axis=-1, keepdims=True)
    inv = jax.lax.rsqrt(var + LN_EPS)
    gamma = gb_ref[0:1, :].astype(jnp.float32)
    beta = gb_ref[1:2, :].astype(jnp.float32)
    y = centered * inv * gamma + beta
    o_ref[...] = (y + r_ref[...].astype(jnp.float32)).astype(o_ref.dtype)


# ---------------------------------------------------------------------------
# Tiling / wrapper
# ---------------------------------------------------------------------------
def _round_up(n, m):
    return ((n + m - 1) // m) * m


def _vmem_capacity_bytes():
    """Chip-aware VMEM capacity (v5e/v6e 128 MiB, v7x 64 MiB per TC)."""
    try:
        return int(pltpu.get_tpu_info().vmem_capacity_bytes)
    except Exception:
        return 64 * (1 << 20)  # conservative fallback = smallest (v7x per-core)


def _pick_tile_rows(rows, d, in_itemsize, out_itemsize, fused, vmem_cap):
    """Byte-targeted row tiles.

    Big enough to amortize the ~0.35us/grid-step overhead and keep HBM busy,
    small enough that double-buffered I/O plus the live f32 intermediates fit
    the chip's VMEM, and capped so large inputs still produce >= 4 grid blocks
    (>= 2 per v7x TensorCore) as long as blocks stay >= ~1 MiB.
    """
    # Sublane multiple of the narrowest dtype (8 f32, 16 bf16, 32 int8/fp8).
    sub = max(8, 32 // max(1, min(in_itemsize, out_itemsize)))

    n_in = 2 if fused else 1
    # Per-row VMEM bytes: double-buffered inputs + output, plus ~3 live f32
    # full-tile temps inside the kernel (x upcast, centered, affine result).
    per_row = 2 * n_in * d * in_itemsize + 2 * d * out_itemsize + 3 * d * 4
    budget = int(0.40 * vmem_cap)
    max_by_vmem = max(sub, budget // per_row)

    rows_rounded = _round_up(rows, sub)
    tile = min(int(max_by_vmem), rows_rounded)

    # Feed both v7x TensorCores: aim for >= 4 blocks, but never shrink a block
    # below ~1 MiB of input bytes (per-step overhead would start to show).
    quarter = _round_up(max(1, (rows + 3) // 4), sub)
    if quarter * d * in_itemsize >= (1 << 20):
        tile = min(tile, quarter)

    tile = max(sub, (tile // sub) * sub)
    return int(tile)


def layernorm_pallas(x, gamma_beta, *, residual=None, tile_rows=None):
    """LayerNorm over the last axis of x (any leading shape).

    gamma_beta: (2, D) array, row 0 = gamma, row 1 = beta.
    residual:   optional array broadcast-compatible with x; if given, the
                kernel writes LayerNorm(x) + residual directly (fused).
    """
    orig_shape = x.shape
    d = orig_shape[-1]
    x2 = x.reshape(-1, d)
    rows = x2.shape[0]
    fused = residual is not None

    in_itemsize = jnp.dtype(x.dtype).itemsize
    out_itemsize = in_itemsize
    vmem_cap = _vmem_capacity_bytes()
    if tile_rows is None:
        tile_rows = _pick_tile_rows(rows, d, in_itemsize, out_itemsize, fused, vmem_cap)

    # Ragged tail: the kernel may compute LN on whatever sits in the
    # out-of-range sublanes of the final block; rows are independent and the
    # edge-block writeback is bounded by the true array shape, so valid rows
    # are never affected.
    grid = (pl.cdiv(rows, tile_rows),)

    in_specs = [
        pl.BlockSpec((tile_rows, d), lambda i: (i, 0)),
        pl.BlockSpec((2, d), lambda i: (0, 0)),
    ]
    args = [x2, gamma_beta]
    kernel = _layernorm_kernel
    if fused:
        in_specs.append(pl.BlockSpec((tile_rows, d), lambda i: (i, 0)))
        args.append(residual.reshape(-1, d))
        kernel = _layernorm_residual_kernel

    out = pl.pallas_call(
        kernel,
        out_shape=jax.ShapeDtypeStruct((rows, d), x.dtype),
        grid_spec=pltpu.PrefetchScalarGridSpec(
            num_scalar_prefetch=0,
            grid=grid,
            in_specs=in_specs,
            out_specs=pl.BlockSpec((tile_rows, d), lambda i: (i, 0)),
        ),
        compiler_params=pltpu.CompilerParams(
            dimension_semantics=("parallel",),          # shard rows over v7x TCs
            vmem_limit_bytes=int(0.75 * vmem_cap),      # chip-aware scoped limit
        ),
    )(*args)

    return out.reshape(orig_shape)


# ---------------------------------------------------------------------------
# Module
# ---------------------------------------------------------------------------
class PreNormPallas:
    """JAX/Pallas equivalent of the PyTorch PreNorm module."""

    def __init__(self, dim, fn, key, *, fuse_residual_add=False):
        # nn.LayerNorm(dim) parameters: weight (dim,), bias (dim,).
        # Deterministic synthetic init (exercises the affine path).
        kg, kb = jax.random.split(key)
        self.gamma = 1.0 + 0.1 * jax.random.normal(kg, (dim,), jnp.float32)
        self.beta = 0.1 * jax.random.normal(kb, (dim,), jnp.float32)
        # Precompute the merged (2, D) affine stream once (no per-call concat).
        self.gb = jnp.concatenate(
            [self.gamma.reshape(1, dim), self.beta.reshape(1, dim)], axis=0
        )
        self.fn = fn
        # Only valid when `fn` is known to be the plain residual add
        # (x_normed + map_attn); then the add is fused into the LN kernel.
        self.fuse_residual_add = fuse_residual_add

    def __call__(self, x, map_attn, add_Map, **kwargs):
        if self.fuse_residual_add and add_Map:
            fused_out = layernorm_pallas(x, self.gb, residual=map_attn)
            return fused_out, map_attn
        x_normed = layernorm_pallas(x, self.gb)
        return self.fn(x_normed, map_attn, add_Map, **kwargs)


def _placeholder_fn(x_normed, map_attn, add_Map):
    # Stand-in for the injected Attention / FeedForward sub-module.
    if add_Map:
        return x_normed + map_attn, map_attn
    return x_normed, map_attn


def _layernorm_ref(x, gamma, beta):
    x32 = x.astype(jnp.float32)
    mean = jnp.mean(x32, axis=-1, keepdims=True)
    var = jnp.mean((x32 - mean) ** 2, axis=-1, keepdims=True)
    y = (x32 - mean) * jax.lax.rsqrt(var + LN_EPS)
    return (y * gamma + beta).astype(x.dtype)


if __name__ == "__main__":
    key = jax.random.PRNGKey(0)
    k_x, k_m, k_p = jax.random.split(key, 3)

    # Small demo shapes; D = 128 keeps the lane (last) dim vreg-dense.
    B, N, D = 2, 8, 128
    x = jax.random.normal(k_x, (B, N, D), jnp.float32)
    map_attn = jax.random.normal(k_m, (B, N, D), jnp.float32)
    add_Map = True

    # --- General path: arbitrary fn, unfused LN kernel -----------------------
    prenorm = PreNormPallas(D, _placeholder_fn, k_p)
    out, attn = prenorm(x, map_attn, add_Map)
    out = jax.block_until_ready(out)
    attn = jax.block_until_ready(attn)

    ref_out, ref_attn = _placeholder_fn(
        _layernorm_ref(x, prenorm.gamma, prenorm.beta), map_attn, add_Map
    )
    assert jnp.allclose(out, ref_out, atol=1e-5, rtol=1e-5), "LayerNorm mismatch"
    assert jnp.allclose(attn, ref_attn), "map_attn passthrough mismatch"

    # --- Fused LN + residual-add path (fn known to be a residual add) --------
    prenorm_fused = PreNormPallas(D, _placeholder_fn, k_p, fuse_residual_add=True)
    out_f, attn_f = prenorm_fused(x, map_attn, add_Map)
    out_f = jax.block_until_ready(out_f)
    ref_f, _ = _placeholder_fn(
        _layernorm_ref(x, prenorm_fused.gamma, prenorm_fused.beta), map_attn, True
    )
    assert jnp.allclose(out_f, ref_f, atol=1e-5, rtol=1e-5), "fused LN+add mismatch"
    assert jnp.allclose(attn_f, map_attn), "fused map_attn passthrough mismatch"

    # --- Ragged (rows % tile_rows != 0) path ---------------------------------
    x_ragged = jax.random.normal(k_x, (3, 7, D), jnp.float32)
    y_ragged = jax.block_until_ready(
        layernorm_pallas(x_ragged, prenorm.gb, tile_rows=8)
    )
    y_ragged_ref = _layernorm_ref(x_ragged, prenorm.gamma, prenorm.beta)
    assert jnp.allclose(y_ragged, y_ragged_ref, atol=1e-5, rtol=1e-5), "ragged mismatch"

    print("KERNEL_OK")
</pallas_src>

<mosaic_0001>
module attributes {stable_mosaic.version = 11 : i64} {
  func.func @_layernorm_kernel(%arg0: i32, %arg1: memref<16x128xf32, #tpu.memory_space<vmem>>, %arg2: memref<2x128xf32, #tpu.memory_space<vmem>>, %arg3: memref<16x128xf32, #tpu.memory_space<vmem>>) attributes {dimension_semantics = [#tpu.dimension_semantics<parallel>], iteration_bounds = array<i64: 1>, scalar_prefetch = 0 : i64, scratch_operands = 0 : i64, tpu.core_type = #tpu.core_type<tc>, window_params = [{transform_indices = @transform_0, window_bounds = array<i64: 16, 128>}, {pipeline_mode = #tpu.pipeline_mode<synchronous>, transform_indices = @transform_1, window_bounds = array<i64: 2, 128>}, {transform_indices = @transform_2, window_bounds = array<i64: 16, 128>}]} {
    %c0 = arith.constant 0 : index
    %c0_0 = arith.constant 0 : index
    %0 = vector.load %arg1[%c0, %c0_0] : memref<16x128xf32, #tpu.memory_space<vmem>>, vector<16x128xf32>
    %cst = arith.constant dense<0.000000e+00> : vector<16xf32>
    %1 = vector.multi_reduction <add>, %0, %cst [1] : vector<16x128xf32> to vector<16xf32>
    %2 = vector.shape_cast %1 : vector<16xf32> to vector<16x1xf32>
    %cst_1 = arith.constant 1.280000e+02 : f32
    %3 = vector.broadcast %cst_1 : f32 to vector<16x1xf32>
    %4 = arith.divf %2, %3 : vector<16x1xf32>
    %5 = vector.broadcast %4 : vector<16x1xf32> to vector<16x128xf32>
    %6 = arith.subf %0, %5 : vector<16x128xf32>
    %7 = arith.mulf %6, %6 : vector<16x128xf32>
    %cst_2 = arith.constant dense<0.000000e+00> : vector<16xf32>
    %8 = vector.multi_reduction <add>, %7, %cst_2 [1] : vector<16x128xf32> to vector<16xf32>
    %9 = vector.shape_cast %8 : vector<16xf32> to vector<16x1xf32>
    %cst_3 = arith.constant 1.280000e+02 : f32
    %10 = vector.broadcast %cst_3 : f32 to vector<16x1xf32>
    %11 = arith.divf %9, %10 : vector<16x1xf32>
    %cst_4 = arith.constant 9.99999974E-6 : f32
    %12 = vector.broadcast %cst_4 : f32 to vector<16x1xf32>
    %13 = arith.addf %11, %12 : vector<16x1xf32>
    %14 = math.rsqrt %13 : vector<16x1xf32>
    %c0_5 = arith.constant 0 : index
    %c0_6 = arith.constant 0 : index
    %15 = vector.load %arg2[%c0_5, %c0_6] : memref<2x128xf32, #tpu.memory_space<vmem>>, vector<1x128xf32>
    %c1 = arith.constant 1 : index
    %c0_7 = arith.constant 0 : index
    %16 = vector.load %arg2[%c1, %c0_7] : memref<2x128xf32, #tpu.memory_space<vmem>>, vector<1x128xf32>
    %17 = vector.broadcast %14 : vector<16x1xf32> to vector<16x128xf32>
    %18 = arith.mulf %6, %17 : vector<16x128xf32>
    %19 = vector.broadcast %15 : vector<1x128xf32> to vector<16x128xf32>
    %20 = arith.mulf %18, %19 : vector<16x128xf32>
    %21 = vector.broadcast %16 : vector<1x128xf32> to vector<16x128xf32>
    %22 = arith.addf %20, %21 : vector<16x128xf32>
    %c0_8 = arith.constant 0 : index
    %c0_9 = arith.constant 0 : index
    %23 = vector.load %arg3[%c0_8, %c0_9] : memref<16x128xf32, #tpu.memory_space<vmem>>, vector<16x128xf32>
    tpu.vector_store %arg3[%c0_8, %c0_9], %22 {strides = array<i32>} : memref<16x128xf32, #tpu.memory_space<vmem>>, vector<16x128xf32>,
    return
  }
  func.func @transform_0(%arg0: i32) -> (i32, i32) {
    %c0_i32 = arith.constant 0 : i32
    %c0_i32_0 = arith.constant 0 : i32
    return %arg0, %c0_i32 : i32, i32
  }
  func.func @transform_1(%arg0: i32) -> (i32, i32) {
    %c0_i32 = arith.constant 0 : i32
    %c0_i32_0 = arith.constant 0 : i32
    %c0_i32_1 = arith.constant 0 : i32
    return %c0_i32, %c0_i32_0 : i32, i32
  }
  func.func @transform_2(%arg0: i32) -> (i32, i32) {
    %c0_i32 = arith.constant 0 : i32
    %c0_i32_0 = arith.constant 0 : i32
    return %arg0, %c0_i32 : i32, i32
  }
}

</mosaic_0001>

<bundles_post_ra>
// kernel: tpu_custom_call.1
= control target key start
LH: loop header
LB: loop body
LE: loop exit
PB: predicated region body
PF: predicated region fallthrough
CT: control target
= control target key end

     0   :  { %7 = vsyncpa [#allocation3], 0  ;;  %s249_s0 = inlined_call_operand.hbm [shape: f32[16,128], index: 0, kind: input, shape index: {}]   ;;  %s250_s1 = inlined_call_operand.hbm [shape: f32[2,128], index: 1, kind: input, shape index: {}]   ;;  %s251_s2 = inlined_call_operand.hbm [shape: f32[16,128], index: 2, kind: output, shape index: {}]  }
   0x1   :  { %8 = vsyncpa [#allocation6], 0 }
   0x2   :  { %9 = vsyncpa [#allocation4], 0  ;;  %s14_s11 = sshll.u32 %s249_s0, 4  ;;  %s213_s12 = smov [#allocation2]   ;;  %s15_s11 = int_to_ptr.hbm [resolvable:$true] %s14_s11 }
   0x3   :  { %s16_s13 = sshll.u32 %s213_s12, 4  ;;  %s28_s16 = sshll.u32 %s250_s1, 4  ;;  %s17_s13 = int_to_ptr.vmem [resolvable:$true] %s16_s13  ;;  %s29_s16 = int_to_ptr.hbm [resolvable:$true] %s28_s16 }
   0x4   :  { %s214_s17 = smov 128   ;;  %s215_s18 = smov 8  }
   0x5   :  { %22 = dma.hbm_to_vmem [thread:$0]  %s15_s11, 256, %s17_s13, [#allocation3], %s214_s17, %s214_s17, %s215_s18  }
   0x6   :  { %s216_s19 = smov [#allocation5]  }
   0x7   :  { %s30_s20 = sshll.u32 %s216_s19, 4  ;;  %s31_s20 = int_to_ptr.vmem [resolvable:$true] %s30_s20 }
   0x8   :  { %33 = dma.hbm_to_vmem [thread:$0]  %s29_s16, 32, %s31_s20, [#allocation6]  }
   0x9   :  { %207 = dma.done.wait [#allocation3], 256  }
   0xa   :  { %208 = vsyncadd [#allocation3], 4294967040 }
   0xb   :  { %209 = dma.done.wait [#allocation6], 32  }
   0xc   :  { %210 = vsyncadd [#allocation6], 4294967264  ;;  %v42_v0 = vld [vmem:[#allocation2] sm:$0xff]  ;;  %v43_v1 = vld [vmem:[#allocation2 + $0x8] sm:$0xff]  ;;  %v217_v2 = vmov 128.0   ;;  %s218_s0 = smov [#allocation7]  }
   0xd   :  { %44 = vadd.xlane.f32.xlu0 %v42_v0  ;;  %129 = vrcp.f32 %v217_v2  ;;  %v127_v31 = vld [vmem:[#allocation5] ss:$0 sm:$0xff]  ;;  %v128_v35 = vld [vmem:[#allocation5 + $0x1] ss:$0 sm:$0xff]  ;;  %s105_s1 = sshll.u32 %s218_s0, 4  ;;  %s107_s23 = sshll.u32 %s251_s2, 4  ;;  %s106_s1 = int_to_ptr.vmem [resolvable:$true] %s105_s1  ;;  %s108_s23 = int_to_ptr.hbm [resolvable:$true] %s107_s23 }
  0x13   :  { %v130_v3 = vpop.eup %129 }
  0x14   :  { %v49_v4 = vmul.f32 128.0, %v130_v3  ;;  %vm53_vm0 = vweird.f32 %v130_v3 }
  0x15   :  { %46 = vadd.xlane.f32.xlu0 %v43_v1 }
  0x16   :  { %v50_v5 = vsub.f32 1.0, %v49_v4 }
  0x18   :  { %v51_v6 = vmul.f32 %v130_v3, %v50_v5 }
  0x1a   :  { %v52_v7 = vadd.f32 %v130_v3, %v51_v6 }
  0x1c   :  { %v54_v8 = vsel %vm53_vm0, %v130_v3, %v52_v7 }
  0x80   :  { %v45_v9 = vpop.xlane.xlu0 %44 }
  0x81   :  { %v55_v10 = vmul.f32 %v54_v8, %v45_v9 }
  0x83   :  { %v57_v11 = vsub.f32 %v42_v0, %v55_v10 }
  0x85   :  { %v59_v12 = vmul.f32 %v57_v11, %v57_v11 }
  0x87   :  { %61 = vadd.xlane.f32.xlu1 %v59_v12 }
  0x88   :  { %v47_v13 = vpop.xlane.xlu0 %46 }
  0x89   :  { %v56_v14 = vmul.f32 %v54_v8, %v47_v13 }
  0x8b   :  { %v58_v15 = vsub.f32 %v43_v1, %v56_v14 }
  0x8d   :  { %v60_v16 = vmul.f32 %v58_v15, %v58_v15 }
  0x8f   :  { %63 = vadd.xlane.f32.xlu1 %v60_v16 }
  0xfa   :  { %v62_v17 = vpop.xlane.xlu1 %61 }
  0xfb   :  { %v65_v18 = vmul.f32 %v62_v17, %v54_v8 }
  0xfd   :  { %v67_v19 = vadd.f32 1e-05, %v65_v18 }
  0xff   :  { %131 = vrsqrt.f32 %v67_v19  ;;  %vm75_vm2 = vweird.f32 %v67_v19 }
 0x102   :  { %v64_v20 = vpop.xlane.xlu1 %63 }
 0x103   :  { %v66_v21 = vmul.f32 %v64_v20, %v54_v8 }
 0x105   :  { %v132_v22 = vpop.eup %131  ;;  %v68_v23 = vadd.f32 1e-05, %v66_v21 }
 0x106   :  { %v70_v24 = vmul.f32 %v132_v22, %v67_v19  ;;  %vm76_vm1 = vweird.f32 %v132_v22 }
 0x107   :  { %133 = vrsqrt.f32 %v68_v23  ;;  %vm77_vm3 = vmor %vm75_vm2, %vm76_vm1  ;;  %vm85_vm5 = vweird.f32 %v68_v23 }
 0x108   :  { %v71_v25 = vmul.f32 %v132_v22, %v70_v24 }
 0x10a   :  { %v72_v26 = vmul.f32 0.5, %v71_v25 }
 0x10c   :  { %v73_v27 = vsub.f32 1.5, %v72_v26 }
 0x10d   :  { %v134_v28 = vpop.eup %133 }
 0x10e   :  { %v74_v29 = vmul.f32 %v132_v22, %v73_v27  ;;  %v80_v30 = vmul.f32 %v134_v28, %v68_v23  ;;  %vm86_vm4 = vweird.f32 %v134_v28 }
 0x10f   :  { %vm87_vm6 = vmor %vm85_vm5, %vm86_vm4 }
 0x110   :  { %v78_v32 = vsel %vm77_vm3, %v132_v22, %v74_v29  ;;  %v81_v33 = vmul.f32 %v134_v28, %v80_v30 }
 0x111   :  { %v91_v34 = vmul.f32 %v78_v32, %v57_v11 }
 0x112   :  { %v82_v36 = vmul.f32 0.5, %v81_v33 }
 0x113   :  { %v94_v37 = vmul.f32 %v127_v31, %v91_v34 }
 0x114   :  { %v83_v38 = vsub.f32 1.5, %v82_v36 }
 0x115   :  { %v97_v39 = vadd.f32 %v128_v35, %v94_v37 }
 0x116   :  { %v84_v40 = vmul.f32 %v134_v28, %v83_v38 }
 0x117   :  { %99 = vst [vmem:[#allocation7] sm:$0xff] %v97_v39 }
 0x118   :  { %v88_v41 = vsel %vm87_vm6, %v134_v28, %v84_v40 }
 0x119   :  { %v92_v42 = vmul.f32 %v88_v41, %v58_v15 }
 0x11b   :  { %v95_v43 = vmul.f32 %v127_v31, %v92_v42 }
 0x11d   :  { %v98_v44 = vadd.f32 %v128_v35, %v95_v43 }
 0x11f   :  { %100 = vst [vmem:[#allocation7 + $0x8] sm:$0xff] %v98_v44 }
 0x120   :  { %113 = dma.vmem_to_hbm [thread:$0]  %s106_s1, 256, %s108_s23, [#allocation4], %s214_s17, %s214_s17, %s215_s18  }
 0x121   :  { %211 = dma.done.wait [#allocation4], 256  }
 0x122   :  { %212 = vsyncadd [#allocation4], 4294967040 }
 0x123   :  { %118 = vsyncpa [#allocation3], 1 }
 0x124   :  { %119 = vsyncpa [#allocation6], 1 }
 0x125   :  { %120 = vsyncpa [#allocation4], 1 }

</bundles_post_ra>
